<compile_context>
chip_gen: v7x
topology: tpu7x:2x2x1
jax: 0.10.0
libtpu: 0.0.40
codegen_flags: <defaults>
</compile_context>

<pallas_src>
import jax
import jax.numpy as jnp
from jax.experimental import pallas as pl
from jax.experimental.pallas import tpu as pltpu


def _round_up(n, m):
    return ((n + m - 1) // m) * m


def _state_propagate_kernel(x_ref, o_ref):
    # Hot path of the (degenerate, parameter-free) forward: propagate the
    # (tm, D) row tile through VMEM unchanged.  Concrete subclasses replace
    # this body with their recurrent / projection compute on the same tiles.
    o_ref[...] = x_ref[...]


def _stream_state(x, *, target_rows=512):
    """Tiled Pallas state propagation of `x` (any leading dims, feature last).

    Flattens to (R, D), tiles R with large row blocks (multiple of 8,
    capped at `target_rows`), keeps D lane-dense on the last axis, and
    streams HBM -> VMEM -> HBM with double-buffered pipelining.
    """
    orig_shape = x.shape
    D = orig_shape[-1]
    x2 = x.reshape(-1, D)
    R = x2.shape[0]

    # Row tile: multiple of 8 sublanes; ~512 rows hits ~85% of HBM roofline
    # (v6e measurement) while leaving a deep grid for pipelining / megacore.
    tm = min(target_rows, _round_up(R, 8))
    tm = max(8, (tm // 8) * 8)

    rows_padded = _round_up(R, tm)
    if rows_padded != R:
        x2 = jnp.pad(x2, ((0, rows_padded - R), (0, 0)))

    grid = (rows_padded // tm,)
    itemsize = jnp.dtype(x.dtype).itemsize
    bytes_accessed = 2 * rows_padded * D * itemsize  # one read + one write

    out2 = pl.pallas_call(
        _state_propagate_kernel,
        out_shape=jax.ShapeDtypeStruct((rows_padded, D), x.dtype),
        grid_spec=pltpu.PrefetchScalarGridSpec(
            num_scalar_prefetch=0,
            grid=grid,
            in_specs=[pl.BlockSpec((tm, D), lambda i: (i, 0))],
            out_specs=pl.BlockSpec((tm, D), lambda i: (i, 0)),
        ),
        compiler_params=pltpu.CompilerParams(
            dimension_semantics=("parallel",),
            # Explicit scoped-VMEM budget: fits v5e/v6e (128 MiB phys) and
            # leaves headroom on v7x (64 MiB phys); tiles here are << limit.
            vmem_limit_bytes=32 * 1024 * 1024,
        ),
        cost_estimate=pl.CostEstimate(
            flops=0, transcendentals=0, bytes_accessed=int(bytes_accessed)
        ),
    )(x2)

    if rows_padded != R:
        out2 = out2[:R]
    return out2.reshape(orig_shape)


# --- EncoderDecoder composition (mirrors the PyTorch forward) ---------------

def encoder_forward(enc_X):
    # Base Encoder: no parameters -> encoder state == enc_X (Pallas-streamed).
    return _stream_state(enc_X)


def decoder_init_state(enc_outputs):
    # Base Decoder.init_state: pass-through; short-circuit at the JAX level
    # (no HBM round trip for a pure identity — review feedback #2).
    return enc_outputs


def decoder_forward(dec_X, dec_state):
    # Base Decoder: no parameters -> output == dec_X, state carried alongside.
    return _stream_state(dec_X), dec_state


def encoder_decoder_forward(enc_X, dec_X):
    enc_outputs = encoder_forward(enc_X)
    dec_state = decoder_init_state(enc_outputs)
    return decoder_forward(dec_X, dec_state)


if __name__ == "__main__":
    key = jax.random.PRNGKey(0)
    k_enc, k_dec = jax.random.split(key)

    # Small demo shapes: batch=2, seq=8, feature=128 (lane-aligned).
    B, T_enc, T_dec, D = 2, 8, 8, 128
    enc_X = jax.random.normal(k_enc, (B, T_enc, D), dtype=jnp.float32)
    dec_X = jax.random.normal(k_dec, (B, T_dec, D), dtype=jnp.float32)

    out, state = encoder_decoder_forward(enc_X, dec_X)
    out = jax.block_until_ready(out)
    state = jax.block_until_ready(state)

    # Base-class semantics: decoder output == dec_X, decoder state == enc_X.
    assert out.shape == dec_X.shape and out.dtype == dec_X.dtype
    assert state.shape == enc_X.shape and state.dtype == enc_X.dtype
    assert bool(jnp.allclose(out, dec_X))
    assert bool(jnp.allclose(state, enc_X))

    print("KERNEL_OK")
</pallas_src>

<mosaic_0001>
module attributes {stable_mosaic.version = 11 : i64} {
  func.func @_state_propagate_kernel(%arg0: i32, %arg1: memref<16x128xf32, #tpu.memory_space<vmem>>, %arg2: memref<16x128xf32, #tpu.memory_space<vmem>>) attributes {dimension_semantics = [#tpu.dimension_semantics<parallel>], iteration_bounds = array<i64: 1>, scalar_prefetch = 0 : i64, scratch_operands = 0 : i64, tpu.core_type = #tpu.core_type<tc>, window_params = [{transform_indices = @transform_0, window_bounds = array<i64: 16, 128>}, {transform_indices = @transform_1, window_bounds = array<i64: 16, 128>}]} {
    %c0 = arith.constant 0 : index
    %c0_0 = arith.constant 0 : index
    %0 = vector.load %arg1[%c0, %c0_0] : memref<16x128xf32, #tpu.memory_space<vmem>>, vector<16x128xf32>
    %c0_1 = arith.constant 0 : index
    %c0_2 = arith.constant 0 : index
    %1 = vector.load %arg2[%c0_1, %c0_2] : memref<16x128xf32, #tpu.memory_space<vmem>>, vector<16x128xf32>
    tpu.vector_store %arg2[%c0_1, %c0_2], %0 {strides = array<i32>} : memref<16x128xf32, #tpu.memory_space<vmem>>, vector<16x128xf32>,
    return
  }
  func.func @transform_0(%arg0: i32) -> (i32, i32) {
    %c0_i32 = arith.constant 0 : i32
    %c0_i32_0 = arith.constant 0 : i32
    return %arg0, %c0_i32 : i32, i32
  }
  func.func @transform_1(%arg0: i32) -> (i32, i32) {
    %c0_i32 = arith.constant 0 : i32
    %c0_i32_0 = arith.constant 0 : i32
    return %arg0, %c0_i32 : i32, i32
  }
}

</mosaic_0001>

<bundles_post_ra>
// kernel: tpu_custom_call.1
= control target key start
LH: loop header
LB: loop body
LE: loop exit
PB: predicated region body
PF: predicated region fallthrough
CT: control target
= control target key end

     0   :  { %6 = vsyncpa [#allocation3], 0  ;;  %s134_s0 = inlined_call_operand.hbm [shape: f32[16,128], index: 0, kind: input, shape index: {}]   ;;  %s135_s1 = inlined_call_operand.hbm [shape: f32[16,128], index: 1, kind: output, shape index: {}]  }
   0x1   :  { %7 = vsyncpa [#allocation4], 0  ;;  %s96_s6 = smov [#allocation2]   ;;  %s48_s10 = scalar_lea.hbm %s134_s0, 256 }
   0x2   :  { %s13_s7 = sshll.u32 %s96_s6, 4  ;;  %p49_p0 = scmp.ne.s32.totalorder %s134_s0, %s48_s10  ;;  %s14_s7 = int_to_ptr.vmem [resolvable:$true] %s13_s7 }
   0x3   :  { %p52_p1 = scmp.lt.u32.totalorder %s48_s10, %s134_s0 }
   0x5   :  { %p54_p2 = pnand %p52_p1, %p49_p0 }
   0x7   :  { %57 = shalt.err (!%p54_p2)
}
   0x8   :  { %s58_s15 = scalar_lea.vmem %s14_s7, 256  ;;  %p63_p4 = scmp.lt.s32.totalorder %s14_s7, %s14_s7 }
   0x9   :  { %p59_p3 = scmp.ne.s32.totalorder %s14_s7, %s58_s15  ;;  %p64_p5 = scmp.lt.s32.totalorder %s58_s15, %s58_s15 }
   0xb   :  { %p65_p6 = por %p64_p5, %p63_p4 }
   0xd   :  { %p66_p7 = pnand %p65_p6, %p59_p3 }
   0xf   :  { %69 = shalt.err (!%p66_p7)
}
  0x10   :  { %s97_s16 = smov 128   ;;  %s98_s17 = smov 8  }
  0x11   :  { %19 = dma.hbm_to_vmem [thread:$0]  %s134_s0, 256, %s14_s7, [#allocation3], %s97_s16, %s97_s16, %s98_s17  }
  0x12   :  { %92 = dma.done.wait [#allocation3], 256  }
  0x13   :  { %93 = vsyncadd [#allocation3], 4294967040  ;;  %s99_s20 = smov [#allocation5]   ;;  %v23_v0 = vld [vmem:[#allocation2] sm:$0xff]  ;;  %v24_v1 = vld [vmem:[#allocation2 + $0x8] sm:$0xff] }
  0x14   :  { %s32_s21 = sshll.u32 %s99_s20, 4  ;;  %25 = vst [vmem:[#allocation5] sm:$0xff] %v23_v0  ;;  %26 = vst [vmem:[#allocation5 + $0x8] sm:$0xff] %v24_v1  ;;  %s33_s21 = int_to_ptr.vmem [resolvable:$true] %s32_s21 }
  0x15   :  { %s70_s22 = scalar_lea.vmem %s33_s21, 256  ;;  %p75_p9 = scmp.lt.s32.totalorder %s33_s21, %s33_s21 }
  0x16   :  { %p71_p8 = scmp.ne.s32.totalorder %s33_s21, %s70_s22  ;;  %p76_p10 = scmp.lt.s32.totalorder %s70_s22, %s70_s22 }
  0x18   :  { %p77_p11 = por %p76_p10, %p75_p9 }
  0x1a   :  { %p78_p12 = pnand %p77_p11, %p71_p8 }
  0x1c   :  { %81 = shalt.err (!%p78_p12)
}
  0x1d   :  { %s82_s0 = scalar_lea.hbm %s135_s1, 256 }
  0x1e   :  { %p83_p13 = scmp.ne.s32.totalorder %s135_s1, %s82_s0  ;;  %p86_p0 = scmp.lt.u32.totalorder %s82_s0, %s135_s1 }
  0x20   :  { %p88_p1 = pnand %p86_p0, %p83_p13 }
  0x22   :  { %91 = shalt.err (!%p88_p1)
}
  0x23   :  { %38 = dma.vmem_to_hbm [thread:$0]  %s33_s21, 256, %s135_s1, [#allocation4], %s97_s16, %s97_s16, %s98_s17  }
  0x24   :  { %94 = dma.done.wait [#allocation4], 256  }
  0x25   :  { %95 = vsyncadd [#allocation4], 4294967040 }
  0x26   :  { %42 = vsyncpa [#allocation3], 1 }
  0x27   :  { %43 = vsyncpa [#allocation4], 1 }

</bundles_post_ra>
